<compile_context>
chip_gen: v7x
topology: tpu7x:2x2x1
jax: 0.10.0
libtpu: 0.0.40
codegen_flags: <defaults>
</compile_context>

<pallas_src>
import jax
import jax.numpy as jnp
from jax import lax
from jax.experimental import pallas as pl
from jax.experimental.pallas import tpu as pltpu

LANES = 128
TR_MAX = 2048     # rows per grid step; (2048,128) f32 block = 1 MiB


def _num_tensorcores():
    """2 TensorCores per chip only on v7x-class devices; 1 elsewhere."""
    try:
        kind = jax.devices()[0].device_kind.lower()
    except Exception:
        return 1
    return 2 if "v7" in kind else 1


@jax.jit
def wmse_loss(outputs, labels):
    assert outputs.shape == labels.shape
    n_elem = outputs.size

    # Flatten in native dtype (layout-preserving reshape => no HBM copy).
    o_flat = outputs.reshape(-1)
    l_flat = labels.reshape(-1)

    # Lane alignment. Conv feature maps are always a multiple of 128, so this
    # branch is normally dead. Zero padding in BOTH tensors => err = 0 =>
    # contribution 0, so semantics are preserved.
    # TODO(synk): for non-multiple-of-128 sizes jnp.pad materializes a full
    # copy of both inputs; replace with an in-kernel element mask on the tail
    # if such shapes ever become hot.
    rem = n_elem % LANES
    if rem:
        pad = LANES - rem
        o_flat = jnp.pad(o_flat, (0, pad))
        l_flat = jnp.pad(l_flat, (0, pad))

    rows = o_flat.size // LANES
    o2 = o_flat.reshape(rows, LANES)
    l2 = l_flat.reshape(rows, LANES)

    # Row tile: as large as possible but never larger than the array.
    tr = rows if rows <= TR_MAX else TR_MAX
    num_blocks = pl.cdiv(rows, tr)
    ncores = min(_num_tensorcores(), num_blocks)
    blocks_per_core = pl.cdiv(num_blocks, ncores)

    full_blocks = rows // tr                       # blocks with no ragged rows
    # Mask is only needed for a ragged last block or phantom (clamped) blocks.
    needs_mask = (rows % tr != 0) or (blocks_per_core * ncores != num_blocks)

    def in_index_map(c, i):
        gb = c * blocks_per_core + i
        # Clamp: iterations past the last real block re-read the last block;
        # the masked path zeroes their contribution.
        return (jnp.minimum(gb, num_blocks - 1), 0)

    def kernel(o_ref, l_ref, acc_ref):
        c = pl.program_id(0)
        i = pl.program_id(1)

        @pl.when(i == 0)
        def _():
            acc_ref[...] = jnp.zeros_like(acc_ref)

        err = o_ref[...].astype(jnp.float32) - l_ref[...].astype(jnp.float32)

        # coef = 1.5 - 2*s*(1-s), s = sigmoid(x), x = err (err>=0) or err/2.
        # Exact algebra: s*(1-s) = 0.25*(1 - tanh(x/2)^2)
        #            =>  coef   = 1 + 0.5*tanh(x/2)^2        (one EUP tanh)
        half_x = jnp.where(err >= 0.0, 0.5, 0.25) * err
        t = jnp.tanh(half_x)
        contrib = (err * err) * (1.0 + 0.5 * (t * t))        # (tr, LANES)

        if needs_mask:
            gb = c * blocks_per_core + i

            @pl.when(gb < full_blocks)            # interior blocks: no mask
            def _():
                acc_ref[...] += jnp.sum(contrib, axis=0, keepdims=True)

            @pl.when(gb >= full_blocks)           # ragged / phantom blocks
            def _():
                row_idx = gb * tr + lax.broadcasted_iota(
                    jnp.int32, (tr, LANES), 0)
                masked = jnp.where(row_idx < rows, contrib, 0.0)
                acc_ref[...] += jnp.sum(masked, axis=0, keepdims=True)
        else:
            acc_ref[...] += jnp.sum(contrib, axis=0, keepdims=True)

    if ncores > 1:
        # Actually split the leading axis across the two TensorCores (v7x).
        dim_sems = (pltpu.CORE_PARALLEL, pltpu.ARBITRARY)
    else:
        dim_sems = ("arbitrary", "arbitrary")

    partials = pl.pallas_call(
        kernel,
        out_shape=jax.ShapeDtypeStruct((ncores, LANES), jnp.float32),
        grid_spec=pltpu.PrefetchScalarGridSpec(
            num_scalar_prefetch=0,
            grid=(ncores, blocks_per_core),
            in_specs=[
                pl.BlockSpec((tr, LANES), in_index_map),
                pl.BlockSpec((tr, LANES), in_index_map),
            ],
            # Output block is resident across the inner axis => per-core
            # vector accumulator; no scratch needed.
            out_specs=pl.BlockSpec((1, LANES), lambda c, i: (c, 0)),
        ),
        compiler_params=pltpu.CompilerParams(
            dimension_semantics=dim_sems,
        ),
    )(o2, l2)

    return jnp.sum(partials) / jnp.float32(n_elem)


def _reference(outputs, labels):
    # Direct transcription of the PyTorch module (unfused form) for validation.
    err = outputs.astype(jnp.float32) - labels.astype(jnp.float32)
    sq = err * err
    e1 = jnp.exp(-err)
    e2 = jnp.exp(-0.5 * err)
    coef = jnp.where(
        err >= 0.0,
        1.5 - 2.0 * e1 / (1.0 + e1) ** 2,
        1.5 - 2.0 * e2 / (1.0 + e2) ** 2,
    )
    return jnp.mean(sq * coef)


if __name__ == "__main__":
    key = jax.random.PRNGKey(0)
    k1, k2 = jax.random.split(key)
    # NCHW-shaped example inputs, as the loss is used on conv outputs.
    outputs = jax.random.normal(k1, (2, 4, 16, 16), dtype=jnp.float32)
    labels = jax.random.normal(k2, (2, 4, 16, 16), dtype=jnp.float32)

    loss = wmse_loss(outputs, labels)
    jax.block_until_ready(loss)

    ref = _reference(outputs, labels)
    assert jnp.allclose(loss, ref, rtol=5e-5, atol=1e-6), (loss, ref)

    print("KERNEL_OK")
</pallas_src>

<mosaic_0001>
module attributes {stable_mosaic.version = 11 : i64} {
  func.func @kernel(%arg0: i32, %arg1: i32, %arg2: memref<16x128xf32, #tpu.memory_space<vmem>>, %arg3: memref<16x128xf32, #tpu.memory_space<vmem>>, %arg4: memref<1x128xf32, #tpu.memory_space<vmem>>) attributes {dimension_semantics = [#tpu.dimension_semantics<arbitrary>, #tpu.dimension_semantics<arbitrary>], iteration_bounds = array<i64: 1, 1>, scalar_prefetch = 0 : i64, scratch_operands = 0 : i64, tpu.core_type = #tpu.core_type<tc>, window_params = [{transform_indices = @transform_0, window_bounds = array<i64: 16, 128>}, {transform_indices = @transform_1, window_bounds = array<i64: 16, 128>}, {transform_indices = @transform_2, window_bounds = array<i64: 1, 128>}]} {
    %c0_i32 = arith.constant 0 : i32
    %0 = arith.cmpi eq, %arg1, %c0_i32 : i32
    %1 = arith.extui %0 : i1 to i32
    %c0_i32_0 = arith.constant 0 : i32
    %2 = arith.cmpi ne, %1, %c0_i32_0 : i32
    scf.if %2 {
      %cst_13 = arith.constant 0.000000e+00 : f32
      %25 = vector.broadcast %cst_13 : f32 to vector<1x128xf32>
      %c0_14 = arith.constant 0 : index
      %c0_15 = arith.constant 0 : index
      %26 = vector.load %arg4[%c0_14, %c0_15] : memref<1x128xf32, #tpu.memory_space<vmem>>, vector<1x128xf32>
      tpu.vector_store %arg4[%c0_14, %c0_15], %25 {strides = array<i32>} : memref<1x128xf32, #tpu.memory_space<vmem>>, vector<1x128xf32>,
    } else {
    }
    %c0 = arith.constant 0 : index
    %c0_1 = arith.constant 0 : index
    %3 = vector.load %arg2[%c0, %c0_1] : memref<16x128xf32, #tpu.memory_space<vmem>>, vector<16x128xf32>
    %c0_2 = arith.constant 0 : index
    %c0_3 = arith.constant 0 : index
    %4 = vector.load %arg3[%c0_2, %c0_3] : memref<16x128xf32, #tpu.memory_space<vmem>>, vector<16x128xf32>
    %5 = arith.subf %3, %4 : vector<16x128xf32>
    %cst = arith.constant 0.000000e+00 : f32
    %6 = vector.broadcast %cst : f32 to vector<16x128xf32>
    %7 = arith.cmpf oge, %5, %6 : vector<16x128xf32>
    %cst_4 = arith.constant 5.000000e-01 : f32
    %cst_5 = arith.constant 2.500000e-01 : f32
    %8 = vector.broadcast %cst_4 : f32 to vector<16x128xf32>
    %9 = vector.broadcast %cst_5 : f32 to vector<16x128xf32>
    %10 = arith.select %7, %8, %9 : vector<16x128xi1>, vector<16x128xf32>
    %11 = arith.mulf %10, %5 : vector<16x128xf32>
    %12 = math.tanh %11 : vector<16x128xf32>
    %13 = arith.mulf %5, %5 : vector<16x128xf32>
    %14 = arith.mulf %12, %12 : vector<16x128xf32>
    %cst_6 = arith.constant 5.000000e-01 : f32
    %15 = vector.broadcast %cst_6 : f32 to vector<16x128xf32>
    %16 = arith.mulf %15, %14 : vector<16x128xf32>
    %cst_7 = arith.constant 1.000000e+00 : f32
    %17 = vector.broadcast %cst_7 : f32 to vector<16x128xf32>
    %18 = arith.addf %17, %16 : vector<16x128xf32>
    %19 = arith.mulf %13, %18 : vector<16x128xf32>
    %c0_8 = arith.constant 0 : index
    %c0_9 = arith.constant 0 : index
    %20 = vector.load %arg4[%c0_8, %c0_9] : memref<1x128xf32, #tpu.memory_space<vmem>>, vector<1x128xf32>
    %cst_10 = arith.constant dense<0.000000e+00> : vector<128xf32>
    %21 = vector.multi_reduction <add>, %19, %cst_10 [0] : vector<16x128xf32> to vector<128xf32>
    %22 = vector.shape_cast %21 : vector<128xf32> to vector<1x128xf32>
    %23 = arith.addf %20, %22 : vector<1x128xf32>
    %c0_11 = arith.constant 0 : index
    %c0_12 = arith.constant 0 : index
    %24 = vector.load %arg4[%c0_11, %c0_12] : memref<1x128xf32, #tpu.memory_space<vmem>>, vector<1x128xf32>
    tpu.vector_store %arg4[%c0_11, %c0_12], %23 {strides = array<i32>} : memref<1x128xf32, #tpu.memory_space<vmem>>, vector<1x128xf32>,
    return
  }
  func.func @transform_0(%arg0: i32, %arg1: i32) -> (i32, i32) {
    %c1_i32 = arith.constant 1 : i32
    %0 = arith.muli %arg0, %c1_i32 : i32
    %1 = arith.addi %0, %arg1 : i32
    %c0_i32 = arith.constant 0 : i32
    %2 = arith.minsi %1, %c0_i32 : i32
    %c0_i32_0 = arith.constant 0 : i32
    %c0_i32_1 = arith.constant 0 : i32
    return %2, %c0_i32_0 : i32, i32
  }
  func.func @transform_1(%arg0: i32, %arg1: i32) -> (i32, i32) {
    %c1_i32 = arith.constant 1 : i32
    %0 = arith.muli %arg0, %c1_i32 : i32
    %1 = arith.addi %0, %arg1 : i32
    %c0_i32 = arith.constant 0 : i32
    %2 = arith.minsi %1, %c0_i32 : i32
    %c0_i32_0 = arith.constant 0 : i32
    %c0_i32_1 = arith.constant 0 : i32
    return %2, %c0_i32_0 : i32, i32
  }
  func.func @transform_2(%arg0: i32, %arg1: i32) -> (i32, i32) {
    %c0_i32 = arith.constant 0 : i32
    %c0_i32_0 = arith.constant 0 : i32
    return %arg0, %c0_i32 : i32, i32
  }
}

</mosaic_0001>

<bundles_post_ra>
// kernel: wmse_loss.1
= control target key start
LH: loop header
LB: loop body
LE: loop exit
PB: predicated region body
PF: predicated region fallthrough
CT: control target
= control target key end

     0   :  { %v136_v0 = vmov 0.0   ;;  %v137_v7 = vmov 0.25   ;;  %s174_s2 = inlined_call_operand.vmem [shape: f32[1,128], index: 2, kind: output, shape index: {}]   ;;  %s175_s0 = inlined_call_operand.vmem [shape: f32[16,128], index: 0, kind: input, shape index: {}]   ;;  %s176_s1 = inlined_call_operand.vmem [shape: f32[16,128], index: 1, kind: input, shape index: {}]  }
   0x1   :  { %79 = vst [vmem:[%s174_s2] sm:$0x1] %v136_v0  ;;  %v80_v1 = vld [vmem:[%s175_s0] sm:$0xff]  ;;  %v81_v2 = vld [vmem:[%s175_s0 + $0x8] sm:$0xff] }
   0x2   :  { %v82_v3 = vld [vmem:[%s176_s1] sm:$0xff]  ;;  %v83_v4 = vld [vmem:[%s176_s1 + $0x8] sm:$0xff] }
   0x3   :  { %v84_v5 = vsub.f32 %v80_v1, %v82_v3  ;;  %v85_v6 = vsub.f32 %v81_v2, %v83_v4 }
   0x5   :  { %vm86_vm0 = vcmp.ge.f32.partialorder %v84_v5, 0.0  ;;  %vm87_vm1 = vcmp.ge.f32.partialorder %v85_v6, 0.0  ;;  %v94_v16 = vmul.f32 %v84_v5, %v84_v5  ;;  %v95_v18 = vmul.f32 %v85_v6, %v85_v6 }
   0x6   :  { %v88_v8 = vsel %vm86_vm0, 0.5, %v137_v7  ;;  %v89_v9 = vsel %vm87_vm1, 0.5, %v137_v7 }
   0x7   :  { %v90_v10 = vmul.f32 %v88_v8, %v84_v5  ;;  %v91_v11 = vmul.f32 %v89_v9, %v85_v6 }
   0x8   :  { %v104_v30 = vld [vmem:[%s174_s2] sm:$0x1] }
   0x9   :  { %132 = vtanh.f32 %v90_v10 }
   0xa   :  { %134 = vtanh.f32 %v91_v11 }
  0x13   :  { %v133_v12 = vpop.eup %132 }
  0x14   :  { %v135_v13 = vpop.eup %134  ;;  %v96_v14 = vmul.f32 %v133_v12, %v133_v12 }
  0x15   :  { %v97_v15 = vmul.f32 %v135_v13, %v135_v13 }
  0x16   :  { %v98_v17 = vmul.f32 0.5, %v96_v14 }
  0x17   :  { %v99_v19 = vmul.f32 0.5, %v97_v15 }
  0x18   :  { %v100_v20 = vadd.f32 1.0, %v98_v17 }
  0x19   :  { %v101_v21 = vadd.f32 1.0, %v99_v19 }
  0x1a   :  { %v102_v22 = vmul.f32 %v100_v20, %v94_v16 }
  0x1b   :  { %v103_v23 = vmul.f32 %v101_v21, %v95_v18 }
  0x1d   :  { %v105_v24 = vadd.f32 %v103_v23, %v102_v22 }
  0x1f   :  { %v106_v25 = vrot.slane %v105_v24, 4 }
  0x21   :  { %v107_v26 = vadd.f32 %v106_v25, %v105_v24 }
  0x23   :  { %v108_v27 = vrot.slane %v107_v26, 2 }
  0x25   :  { %v109_v28 = vadd.f32 %v108_v27, %v107_v26 }
  0x27   :  { %v110_v29 = vrot.slane %v109_v28, 1 }
  0x29   :  { %v111_v31 = vadd.f32 %v110_v29, %v109_v28 }
  0x2b   :  { %v112_v32 = vadd.f32 %v111_v31, %v104_v30 }
  0x2d   :  { %113 = vst [vmem:[%s174_s2] sm:$0x1] %v112_v32 }

</bundles_post_ra>
